<compile_context>
chip_gen: v5e
topology: v5e:2x2
jax: 0.10.0
libtpu: 0.0.40
codegen_flags: <defaults>
</compile_context>

<pallas_src>
import functools
import math

import jax
import jax.numpy as jnp
from jax.experimental import pallas as pl
from jax.experimental.pallas import tpu as pltpu


# ---------------------------------------------------------------------------
# helpers
# ---------------------------------------------------------------------------
def _round_up(x, m):
    return ((x + m - 1) // m) * m


def _choose_tiles(m, k, n, itemsize, out_like_tiles):
    """Pick (tm, tn) keeping double-buffered blocks well under the 16 MiB
    v5e default scoped VMEM (also leaves headroom on v7x's 64 MiB)."""
    tm = _round_up(m, 8) if m <= 256 else 256
    tn = n
    if n % 128 == 0:
        for cand in (512, 256, 128):
            if n % cand == 0:
                tn = cand
                break
    budget = 12 * 1024 * 1024

    def need(tm_, tn_):
        blocks = (tm_ * k) + (k * tn_) + tn_ + 2 * k + tm_ * tn_ * out_like_tiles
        return 2 * blocks * itemsize          # double-buffered

    while need(tm, tn) > budget:
        if tn > 128 and tn % 256 == 0:
            tn //= 2
        elif tm > 64:
            tm = max(64, _round_up(tm // 2, 8))
        else:
            break
    return tm, tn


# ---------------------------------------------------------------------------
# Kernel 1: fused (optional LayerNorm) -> matmul -> +bias (-> ReLU) (-> +res)
#   LayerNorm matches torch: alpha*(x-mean)/(std_unbiased + 1e-7) + bias
# ---------------------------------------------------------------------------
def _fused_linear_kernel(*refs, apply_ln, activation, has_residual, k_dim):
    idx = 0
    x_ref = refs[idx]; idx += 1
    alpha_ref = beta_ref = None
    if apply_ln:
        alpha_ref, beta_ref = refs[idx], refs[idx + 1]; idx += 2
    w_ref, b_ref = refs[idx], refs[idx + 1]; idx += 2
    res_ref = None
    if has_residual:
        res_ref = refs[idx]; idx += 1
    o_ref = refs[idx]

    x = x_ref[...]
    if apply_ln:
        mean = jnp.mean(x, axis=-1, keepdims=True)
        diff = x - mean
        var = jnp.sum(diff * diff, axis=-1, keepdims=True) / (k_dim - 1)
        inv = pl.reciprocal(jnp.sqrt(var) + 1e-7, approx=False)
        x = alpha_ref[...] * diff * inv + beta_ref[...]

    y = jnp.dot(x, w_ref[...], preferred_element_type=jnp.float32) + b_ref[...]
    if activation == "relu":
        y = jnp.maximum(y, 0.0)
    if res_ref is not None:
        y = y + res_ref[...]
    o_ref[...] = y.astype(o_ref.dtype)


def _fused_linear(x2d, w_kn, b, *, ln=None, activation=None, residual=None):
    """x2d: (M, K); w_kn: (K, N) pre-transposed; b: (N,);
    ln = (alpha, beta) applies LayerNorm over K to x2d before the matmul."""
    m, k = x2d.shape
    n = w_kn.shape[1]
    isz = x2d.dtype.itemsize
    tm, tn = _choose_tiles(m, k, n, isz, 2 if residual is not None else 1)
    gm, gn = pl.cdiv(m, tm), pl.cdiv(n, tn)

    # Grid order: stream whichever operand costs less to re-read.
    x_bytes, w_bytes = m * k * isz, k * n * isz
    m_outer = (x_bytes + w_bytes * gm) <= (w_bytes + x_bytes * gn)
    if m_outer:                               # x read once, weight re-streamed
        grid = (gm, gn)
        xmap = lambda i, j: (i, 0)
        wmap = lambda i, j: (0, j)
        omap = lambda i, j: (i, j)
    else:                                     # weight resident, x re-streamed
        grid = (gn, gm)
        xmap = lambda j, i: (i, 0)
        wmap = lambda j, i: (0, j)
        omap = lambda j, i: (i, j)
    vmap0 = lambda *_: (0, 0)

    in_specs = [pl.BlockSpec((tm, k), xmap)]
    args = [x2d]
    if ln is not None:
        alpha, beta = ln
        in_specs += [pl.BlockSpec((1, k), vmap0), pl.BlockSpec((1, k), vmap0)]
        args += [alpha.reshape(1, k), beta.reshape(1, k)]
    in_specs += [pl.BlockSpec((k, tn), wmap), pl.BlockSpec((1, tn), wmap)]
    args += [w_kn, b.reshape(1, n)]
    if residual is not None:
        in_specs.append(pl.BlockSpec((tm, tn), omap))
        args.append(residual)

    cost = pl.CostEstimate(
        flops=2 * m * k * n,
        transcendentals=0,
        bytes_accessed=x_bytes + w_bytes
        + m * n * isz * (2 if residual is not None else 1),
    )

    return pl.pallas_call(
        functools.partial(_fused_linear_kernel, apply_ln=ln is not None,
                          activation=activation,
                          has_residual=residual is not None, k_dim=k),
        out_shape=jax.ShapeDtypeStruct((m, n), x2d.dtype),
        grid=grid,
        in_specs=in_specs,
        out_specs=pl.BlockSpec((tm, tn), omap),
        compiler_params=pltpu.CompilerParams(
            dimension_semantics=("parallel", "parallel")),
        cost_estimate=cost,
    )(*args)


# ---------------------------------------------------------------------------
# Kernel 2: attention, tiled over (batch, head):
#   softmax(QK^T/sqrt(dh) + bias) @ V
# ---------------------------------------------------------------------------
def _make_attention_kernel(scale, has_bias):
    def kernel(*refs):
        if has_bias:
            q_ref, k_ref, v_ref, bias_ref, o_ref = refs
        else:
            q_ref, k_ref, v_ref, o_ref = refs
        q = q_ref[0, 0]                       # (S, dh)
        k = k_ref[0, 0]
        v = v_ref[0, 0]
        s = jnp.dot(q, k.T, preferred_element_type=jnp.float32) * scale
        if has_bias:
            s = s + bias_ref[0]
        s_max = jnp.max(s, axis=-1, keepdims=True)
        p = jnp.exp(s - s_max)
        p = p * pl.reciprocal(jnp.sum(p, axis=-1, keepdims=True), approx=False)
        # attention-score dropout (p=0.01): eval-mode identity.
        o_ref[0, 0] = jnp.dot(p.astype(v.dtype), v,
                              preferred_element_type=jnp.float32
                              ).astype(o_ref.dtype)
    return kernel


def _attention(q, k, v, bias, dh):
    b, h, s_len, d = q.shape
    has_bias = bias is not None
    qkv_spec = pl.BlockSpec((1, 1, s_len, d), lambda bb, hh: (bb, hh, 0, 0))
    in_specs = [qkv_spec, qkv_spec, qkv_spec]
    args = [q, k, v]
    if has_bias:
        in_specs.append(
            pl.BlockSpec((1, s_len, s_len), lambda bb, hh: (bb, 0, 0)))
        args.append(bias)
    # TODO(synk): for long sequences, add online-softmax (flash) tiling over
    # KV / query-row tiles; per-(batch, head) blocks here are O(S^2) VMEM.
    return pl.pallas_call(
        _make_attention_kernel(1.0 / math.sqrt(dh), has_bias),
        out_shape=jax.ShapeDtypeStruct((b, h, s_len, d), q.dtype),
        grid=(b, h),
        in_specs=in_specs,
        out_specs=pl.BlockSpec((1, 1, s_len, d), lambda bb, hh: (bb, hh, 0, 0)),
        compiler_params=pltpu.CompilerParams(
            dimension_semantics=("parallel", "parallel")),
    )(*args)


# ---------------------------------------------------------------------------
# Parameter preparation (run ONCE, outside jit): transpose to (K, N) layout,
# concatenate Q/K/V weights into one fused projection.
# ---------------------------------------------------------------------------
def prepare_params(p):
    return {
        "alpha1": p["alpha1"], "beta1": p["bias1"],
        "alpha2": p["alpha2"], "beta2": p["bias2"],
        "w_qkv": jnp.concatenate([p["wq"], p["wk"], p["wv"]], axis=0).T,
        "b_qkv": jnp.concatenate([p["bq"], p["bk"], p["bv"]]),
        "w_o": p["wo"].T, "b_o": p["bo"],
        "w_ff1": p["w_ff1"].T, "b_ff1": p["b_ff1"],
        "w_ff2": p["w_ff2"].T, "b_ff2": p["b_ff2"],
    }


# ---------------------------------------------------------------------------
# EncoderLayer forward
# ---------------------------------------------------------------------------
def encoder_layer_forward(x, p, mask=None, g_mask=None, *, n_heads):
    b, s_len, d = x.shape
    dh = d // n_heads
    m = b * s_len
    x2d = x.reshape(m, d)

    # Additive attention bias: masked_fill(-50000) folded into an add.  Masked
    # logits underflow to probability 0 either way, so softmax matches torch
    # exactly whenever a query row has at least one unmasked key.
    bias = None
    if mask is not None:
        bias = jnp.where(mask == 0, -50000.0, 0.0).astype(jnp.float32)
    if g_mask is not None:
        g = g_mask.astype(jnp.float32)
        bias = (g + bias) if bias is not None else \
            jnp.broadcast_to(g, (b, s_len, s_len))

    # --- sub-layer 1: fused pre-LN + QKV projection (one matmul, N = 3*d) ---
    qkv = _fused_linear(x2d, p["w_qkv"], p["b_qkv"],
                        ln=(p["alpha1"], p["beta1"]))
    # Head split matches PyTorch .view(B, H, -1, dh): a plain reshape.
    q = qkv[:, :d].reshape(b, n_heads, s_len, dh)
    k = qkv[:, d:2 * d].reshape(b, n_heads, s_len, dh)
    v = qkv[:, 2 * d:].reshape(b, n_heads, s_len, dh)
    att = _attention(q, k, v, bias, dh).reshape(m, d)
    # dropout1 (p=0.01): eval identity; residual fused into the o-proj matmul.
    x2d = _fused_linear(att, p["w_o"], p["b_o"], residual=x2d)

    # --- sub-layer 2: fused pre-LN + FF1(+ReLU), then FF2 + fused residual ---
    hidden = _fused_linear(x2d, p["w_ff1"], p["b_ff1"],
                           ln=(p["alpha2"], p["beta2"]), activation="relu")
    # FF dropout + dropout2 (p=0.01): eval identity; residual fused.
    x2d = _fused_linear(hidden, p["w_ff2"], p["b_ff2"], residual=x2d)

    return x2d.reshape(b, s_len, d)


# ---------------------------------------------------------------------------
# Pure-JAX reference (mirrors the PyTorch forward exactly, eval mode)
# ---------------------------------------------------------------------------
def _reference_forward(x, params, mask, g_mask, *, n_heads):
    b, s, d_model = x.shape
    dh = d_model // n_heads

    def layernorm(t, alpha, bias):
        mean = jnp.mean(t, axis=-1, keepdims=True)
        std = jnp.std(t, axis=-1, keepdims=True, ddof=1)   # torch: unbiased
        return alpha * (t - mean) / (std + 1e-7) + bias

    def linear(t, w, bvec):
        return jnp.matmul(t, w.T) + bvec

    def attention(q, k, v):
        scores = jnp.matmul(q, jnp.swapaxes(k, -1, -2)) / math.sqrt(dh)
        if mask is not None:
            scores = jnp.where(mask[:, None] == 0, -50000.0, scores)
        if g_mask is not None:
            scores = scores + g_mask
        scores = jax.nn.softmax(scores, axis=-1)
        return jnp.matmul(scores, v)

    x1 = layernorm(x, params["alpha1"], params["bias1"])
    q = linear(x1, params["wq"], params["bq"]).reshape(b, n_heads, s, dh)
    k = linear(x1, params["wk"], params["bk"]).reshape(b, n_heads, s, dh)
    v = linear(x1, params["wv"], params["bv"]).reshape(b, n_heads, s, dh)
    att = attention(q, k, v).reshape(b, s, d_model)
    x = x + linear(att, params["wo"], params["bo"])
    x1 = layernorm(x, params["alpha2"], params["bias2"])
    ff = linear(jax.nn.relu(linear(x1, params["w_ff1"], params["b_ff1"])),
                params["w_ff2"], params["b_ff2"])
    return x + ff


# ---------------------------------------------------------------------------
if __name__ == "__main__":
    key = jax.random.PRNGKey(0)
    batch, seq, d_model, n_heads, ff_dim = 2, 8, 32, 4, 64
    ks = jax.random.split(key, 18)

    def _w(kk, shape, fan_in):
        return jax.random.normal(kk, shape, jnp.float32) / jnp.sqrt(float(fan_in))

    def _bv(kk, shape):
        return 0.02 * jax.random.normal(kk, shape, jnp.float32)

    params = {
        "alpha1": 1.0 + 0.1 * jax.random.normal(ks[0], (d_model,), jnp.float32),
        "bias1": _bv(ks[1], (d_model,)),
        "alpha2": 1.0 + 0.1 * jax.random.normal(ks[2], (d_model,), jnp.float32),
        "bias2": _bv(ks[3], (d_model,)),
        "wq": _w(ks[4], (d_model, d_model), d_model), "bq": _bv(ks[5], (d_model,)),
        "wk": _w(ks[6], (d_model, d_model), d_model), "bk": _bv(ks[7], (d_model,)),
        "wv": _w(ks[8], (d_model, d_model), d_model), "bv": _bv(ks[9], (d_model,)),
        "wo": _w(ks[10], (d_model, d_model), d_model), "bo": _bv(ks[11], (d_model,)),
        "w_ff1": _w(ks[12], (ff_dim, d_model), d_model), "b_ff1": _bv(ks[13], (ff_dim,)),
        "w_ff2": _w(ks[14], (d_model, ff_dim), ff_dim), "b_ff2": _bv(ks[15], (d_model,)),
    }

    x = jax.random.normal(ks[16], (batch, seq, d_model), jnp.float32)

    # Padding-style mask: batch 0 attends to all 8 keys, batch 1 to only 6.
    lens = jnp.array([seq, seq - 2])
    key_mask = (jnp.arange(seq)[None, :] < lens[:, None]).astype(jnp.float32)
    mask = jnp.tile(key_mask[:, None, :], (1, seq, 1))          # (B, S, S)
    g_mask = None                                               # no gaussian mask

    prepared = prepare_params(params)   # one-time (K,N) relayout + QKV concat

    fwd = jax.jit(functools.partial(encoder_layer_forward, n_heads=n_heads))
    out = jax.block_until_ready(fwd(x, prepared, mask, g_mask))

    with jax.default_matmul_precision("highest"):
        ref = _reference_forward(x, params, mask, g_mask, n_heads=n_heads)
    ref = jax.block_until_ready(ref)

    assert out.shape == (batch, seq, d_model), out.shape
    max_err = float(jnp.max(jnp.abs(out - ref)))
    assert jnp.allclose(out, ref, atol=5e-3, rtol=5e-3), max_err

    print("KERNEL_OK")
</pallas_src>

<mosaic_0001>
module attributes {stable_mosaic.version = 11 : i64} {
  func.func @_fused_linear_kernel(%arg0: i32, %arg1: i32, %arg2: memref<16x32xf32, #tpu.memory_space<vmem>>, %arg3: memref<1x32xf32, #tpu.memory_space<vmem>>, %arg4: memref<1x32xf32, #tpu.memory_space<vmem>>, %arg5: memref<32x96xf32, #tpu.memory_space<vmem>>, %arg6: memref<1x96xf32, #tpu.memory_space<vmem>>, %arg7: memref<16x96xf32, #tpu.memory_space<vmem>>) attributes {dimension_semantics = [#tpu.dimension_semantics<parallel>, #tpu.dimension_semantics<parallel>], iteration_bounds = array<i64: 1, 1>, scalar_prefetch = 0 : i64, scratch_operands = 0 : i64, tpu.core_type = #tpu.core_type<tc>, window_params = [{transform_indices = @transform_0, window_bounds = array<i64: 16, 32>}, {pipeline_mode = #tpu.pipeline_mode<synchronous>, transform_indices = @transform_1, window_bounds = array<i64: 1, 32>}, {pipeline_mode = #tpu.pipeline_mode<synchronous>, transform_indices = @transform_2, window_bounds = array<i64: 1, 32>}, {transform_indices = @transform_3, window_bounds = array<i64: 32, 96>}, {transform_indices = @transform_4, window_bounds = array<i64: 1, 96>}, {transform_indices = @transform_5, window_bounds = array<i64: 16, 96>}]} {
    %c0 = arith.constant 0 : index
    %c0_0 = arith.constant 0 : index
    %0 = vector.load %arg2[%c0, %c0_0] : memref<16x32xf32, #tpu.memory_space<vmem>>, vector<16x32xf32>
    %cst = arith.constant dense<0.000000e+00> : vector<16xf32>
    %1 = vector.multi_reduction <add>, %0, %cst [1] : vector<16x32xf32> to vector<16xf32>
    %2 = vector.shape_cast %1 : vector<16xf32> to vector<16x1xf32>
    %cst_1 = arith.constant 3.200000e+01 : f32
    %3 = vector.broadcast %cst_1 : f32 to vector<16x1xf32>
    %4 = arith.divf %2, %3 : vector<16x1xf32>
    %5 = vector.broadcast %4 : vector<16x1xf32> to vector<16x32xf32>
    %6 = arith.subf %0, %5 : vector<16x32xf32>
    %7 = arith.mulf %6, %6 : vector<16x32xf32>
    %cst_2 = arith.constant dense<0.000000e+00> : vector<16xf32>
    %8 = vector.multi_reduction <add>, %7, %cst_2 [1] : vector<16x32xf32> to vector<16xf32>
    %9 = vector.shape_cast %8 : vector<16xf32> to vector<16x1xf32>
    %cst_3 = arith.constant 3.100000e+01 : f32
    %10 = vector.broadcast %cst_3 : f32 to vector<16x1xf32>
    %11 = arith.divf %9, %10 : vector<16x1xf32>
    %12 = math.sqrt %11 : vector<16x1xf32>
    %cst_4 = arith.constant 1.000000e-07 : f32
    %13 = vector.broadcast %cst_4 : f32 to vector<16x1xf32>
    %14 = arith.addf %12, %13 : vector<16x1xf32>
    %15 = tpu.reciprocal %14 : vector<16x1xf32> -> vector<16x1xf32>
    %c0_5 = arith.constant 0 : index
    %c0_6 = arith.constant 0 : index
    %16 = vector.load %arg3[%c0_5, %c0_6] : memref<1x32xf32, #tpu.memory_space<vmem>>, vector<1x32xf32>
    %17 = vector.broadcast %16 : vector<1x32xf32> to vector<16x32xf32>
    %18 = arith.mulf %17, %6 : vector<16x32xf32>
    %19 = vector.broadcast %15 : vector<16x1xf32> to vector<16x32xf32>
    %20 = arith.mulf %18, %19 : vector<16x32xf32>
    %c0_7 = arith.constant 0 : index
    %c0_8 = arith.constant 0 : index
    %21 = vector.load %arg4[%c0_7, %c0_8] : memref<1x32xf32, #tpu.memory_space<vmem>>, vector<1x32xf32>
    %22 = vector.broadcast %21 : vector<1x32xf32> to vector<16x32xf32>
    %23 = arith.addf %20, %22 : vector<16x32xf32>
    %c0_9 = arith.constant 0 : index
    %c0_10 = arith.constant 0 : index
    %24 = vector.load %arg5[%c0_9, %c0_10] : memref<32x96xf32, #tpu.memory_space<vmem>>, vector<32x96xf32>
    %cst_11 = arith.constant dense<0.000000e+00> : vector<16x96xf32>
    %25 = tpu.matmul %23, %24, %cst_11 {dimension_numbers = #tpu.dot_dimension_numbers<[1], [0], [0], [1], [0, 0, 1, 1], [], []>} : vector<16x32xf32>, vector<32x96xf32>, vector<16x96xf32> -> vector<16x96xf32>
    %c0_12 = arith.constant 0 : index
    %c0_13 = arith.constant 0 : index
    %26 = vector.load %arg6[%c0_12, %c0_13] : memref<1x96xf32, #tpu.memory_space<vmem>>, vector<1x96xf32>
    %27 = vector.broadcast %26 : vector<1x96xf32> to vector<16x96xf32>
    %28 = arith.addf %25, %27 : vector<16x96xf32>
    %c0_14 = arith.constant 0 : index
    %c0_15 = arith.constant 0 : index
    %29 = vector.load %arg7[%c0_14, %c0_15] : memref<16x96xf32, #tpu.memory_space<vmem>>, vector<16x96xf32>
    tpu.vector_store %arg7[%c0_14, %c0_15], %28 {strides = array<i32>} : memref<16x96xf32, #tpu.memory_space<vmem>>, vector<16x96xf32>,
    return
  }
  func.func @transform_0(%arg0: i32, %arg1: i32) -> (i32, i32) {
    %c0_i32 = arith.constant 0 : i32
    %c0_i32_0 = arith.constant 0 : i32
    return %arg0, %c0_i32 : i32, i32
  }
  func.func @transform_1(%arg0: i32, %arg1: i32) -> (i32, i32) {
    %c0_i32 = arith.constant 0 : i32
    %c0_i32_0 = arith.constant 0 : i32
    %c0_i32_1 = arith.constant 0 : i32
    return %c0_i32, %c0_i32_0 : i32, i32
  }
  func.func @transform_2(%arg0: i32, %arg1: i32) -> (i32, i32) {
    %c0_i32 = arith.constant 0 : i32
    %c0_i32_0 = arith.constant 0 : i32
    %c0_i32_1 = arith.constant 0 : i32
    return %c0_i32, %c0_i32_0 : i32, i32
  }
  func.func @transform_3(%arg0: i32, %arg1: i32) -> (i32, i32) {
    %c0_i32 = arith.constant 0 : i32
    %c0_i32_0 = arith.constant 0 : i32
    return %c0_i32, %arg1 : i32, i32
  }
  func.func @transform_4(%arg0: i32, %arg1: i32) -> (i32, i32) {
    %c0_i32 = arith.constant 0 : i32
    %c0_i32_0 = arith.constant 0 : i32
    return %c0_i32, %arg1 : i32, i32
  }
  func.func @transform_5(%arg0: i32, %arg1: i32) -> (i32, i32) {
    %c0_i32 = arith.constant 0 : i32
    return %arg0, %arg1 : i32, i32
  }
}

module attributes {stable_mosaic.version = 11 : i64} {
  func.func @kernel(%arg0: i32, %arg1: i32, %arg2: memref<1x1x8x8xf32, #tpu.memory_space<vmem>>, %arg3: memref<1x1x8x8xf32, #tpu.memory_space<vmem>>, %arg4: memref<1x1x8x8xf32, #tpu.memory_space<vmem>>, %arg5: memref<1x8x8xf32, #tpu.memory_space<vmem>>, %arg6: memref<1x1x8x8xf32, #tpu.memory_space<vmem>>) attributes {dimension_semantics = [#tpu.dimension_semantics<parallel>, #tpu.dimension_semantics<parallel>], iteration_bounds = array<i64: 2, 4>, scalar_prefetch = 0 : i64, scratch_operands = 0 : i64, tpu.core_type = #tpu.core_type<tc>, window_params = [{transform_indices = @transform_0, window_bounds = array<i64: 1, 1, 8, 8>}, {transform_indices = @transform_1, window_bounds = array<i64: 1, 1, 8, 8>}, {transform_indices = @transform_2, window_bounds = array<i64: 1, 1, 8, 8>}, {transform_indices = @transform_3, window_bounds = array<i64: 1, 8, 8>}, {transform_indices = @transform_4, window_bounds = array<i64: 1, 1, 8, 8>}]} {
    %c0 = arith.constant 0 : index
    %c0_0 = arith.constant 0 : index
    %c0_1 = arith.constant 0 : index
    %c0_2 = arith.constant 0 : index
    %0 = vector.load %arg2[%c0, %c0_0, %c0_1, %c0_2] : memref<1x1x8x8xf32, #tpu.memory_space<vmem>>, vector<1x1x8x8xf32>
    %1 = vector.shape_cast %0 : vector<1x1x8x8xf32> to vector<8x8xf32>
    %c0_3 = arith.constant 0 : index
    %c0_4 = arith.constant 0 : index
    %c0_5 = arith.constant 0 : index
    %c0_6 = arith.constant 0 : index
    %2 = vector.load %arg3[%c0_3, %c0_4, %c0_5, %c0_6] : memref<1x1x8x8xf32, #tpu.memory_space<vmem>>, vector<1x1x8x8xf32>
    %3 = vector.shape_cast %2 : vector<1x1x8x8xf32> to vector<8x8xf32>
    %c0_7 = arith.constant 0 : index
    %c0_8 = arith.constant 0 : index
    %c0_9 = arith.constant 0 : index
    %c0_10 = arith.constant 0 : index
    %4 = vector.load %arg4[%c0_7, %c0_8, %c0_9, %c0_10] : memref<1x1x8x8xf32, #tpu.memory_space<vmem>>, vector<1x1x8x8xf32>
    %5 = vector.shape_cast %4 : vector<1x1x8x8xf32> to vector<8x8xf32>
    %6 = tpu.transpose %3, [1, 0] : vector<8x8xf32> -> vector<8x8xf32>
    %cst = arith.constant dense<0.000000e+00> : vector<8x8xf32>
    %7 = tpu.matmul %1, %6, %cst {dimension_numbers = #tpu.dot_dimension_numbers<[1], [0], [0], [1], [0, 0, 1, 1], [], []>} : vector<8x8xf32>, vector<8x8xf32>, vector<8x8xf32> -> vector<8x8xf32>
    %cst_11 = arith.constant 0.353553385 : f32
    %8 = vector.broadcast %cst_11 : f32 to vector<8x8xf32>
    %9 = arith.mulf %7, %8 : vector<8x8xf32>
    %c0_12 = arith.constant 0 : index
    %c0_13 = arith.constant 0 : index
    %c0_14 = arith.constant 0 : index
    %10 = vector.load %arg5[%c0_12, %c0_13, %c0_14] : memref<1x8x8xf32, #tpu.memory_space<vmem>>, vector<1x8x8xf32>
    %11 = vector.shape_cast %10 : vector<1x8x8xf32> to vector<8x8xf32>
    %12 = arith.addf %9, %11 : vector<8x8xf32>
    %cst_15 = arith.constant dense<0xFF800000> : vector<8xf32>
    %13 = vector.multi_reduction <maximumf>, %12, %cst_15 [1] : vector<8x8xf32> to vector<8xf32>
    %14 = vector.shape_cast %13 : vector<8xf32> to vector<8x1xf32>
    %15 = vector.broadcast %14 : vector<8x1xf32> to vector<8x8xf32>
    %16 = arith.subf %12, %15 : vector<8x8xf32>
    %17 = math.exp %16 : vector<8x8xf32>
    %cst_16 = arith.constant dense<0.000000e+00> : vector<8xf32>
    %18 = vector.multi_reduction <add>, %17, %cst_16 [1] : vector<8x8xf32> to vector<8xf32>
    %19 = vector.shape_cast %18 : vector<8xf32> to vector<8x1xf32>
    %20 = tpu.reciprocal %19 : vector<8x1xf32> -> vector<8x1xf32>
    %21 = vector.broadcast %20 : vector<8x1xf32> to vector<8x8xf32>
    %22 = arith.mulf %17, %21 : vector<8x8xf32>
    %cst_17 = arith.constant dense<0.000000e+00> : vector<8x8xf32>
    %23 = tpu.matmul %22, %5, %cst_17 {dimension_numbers = #tpu.dot_dimension_numbers<[1], [0], [0], [1], [0, 0, 1, 1], [], []>} : vector<8x8xf32>, vector<8x8xf32>, vector<8x8xf32> -> vector<8x8xf32>
    %c0_18 = arith.constant 0 : index
    %c0_19 = arith.constant 0 : index
    %c0_20 = arith.constant 0 : index
    %c0_21 = arith.constant 0 : index
    %24 = vector.load %arg6[%c0_18, %c0_19, %c0_20, %c0_21] : memref<1x1x8x8xf32, #tpu.memory_space<vmem>>, vector<1x1x8x8xf32>
    %25 = vector.shape_cast %24 : vector<1x1x8x8xf32> to vector<8x8xf32>
    %26 = vector.shape_cast %23 : vector<8x8xf32> to vector<1x1x8x8xf32>
    tpu.vector_store %arg6[%c0_18, %c0_19, %c0_20, %c0_21], %26 {strides = array<i32>} : memref<1x1x8x8xf32, #tpu.memory_space<vmem>>, vector<1x1x8x8xf32>,
    return
  }
  func.func @transform_0(%arg0: i32, %arg1: i32) -> (i32, i32, i32, i32) {
    %c0_i32 = arith.constant 0 : i32
    %c0_i32_0 = arith.constant 0 : i32
    %c0_i32_1 = arith.constant 0 : i32
    return %arg0, %arg1, %c0_i32, %c0_i32_0 : i32, i32, i32, i32
  }
  func.func @transform_1(%arg0: i32, %arg1: i32) -> (i32, i32, i32, i32) {
    %c0_i32 = arith.constant 0 : i32
    %c0_i32_0 = arith.constant 0 : i32
    %c0_i32_1 = arith.constant 0 : i32
    return %arg0, %arg1, %c0_i32, %c0_i32_0 : i32, i32, i32, i32
  }
  func.func @transform_2(%arg0: i32, %arg1: i32) -> (i32, i32, i32, i32) {
    %c0_i32 = arith.constant 0 : i32
    %c0_i32_0 = arith.constant 0 : i32
    %c0_i32_1 = arith.constant 0 : i32
    return %arg0, %arg1, %c0_i32, %c0_i32_0 : i32, i32, i32, i32
  }
  func.func @transform_3(%arg0: i32, %arg1: i32) -> (i32, i32, i32) {
    %c0_i32 = arith.constant 0 : i32
    %c0_i32_0 = arith.constant 0 : i32
    %c0_i32_1 = arith.constant 0 : i32
    return %arg0, %c0_i32, %c0_i32_0 : i32, i32, i32
  }
  func.func @transform_4(%arg0: i32, %arg1: i32) -> (i32, i32, i32, i32) {
    %c0_i32 = arith.constant 0 : i32
    %c0_i32_0 = arith.constant 0 : i32
    %c0_i32_1 = arith.constant 0 : i32
    return %arg0, %arg1, %c0_i32, %c0_i32_0 : i32, i32, i32, i32
  }
}

module attributes {stable_mosaic.version = 11 : i64} {
  func.func @_fused_linear_kernel(%arg0: i32, %arg1: i32, %arg2: memref<16x32xf32, #tpu.memory_space<vmem>>, %arg3: memref<32x32xf32, #tpu.memory_space<vmem>>, %arg4: memref<1x32xf32, #tpu.memory_space<vmem>>, %arg5: memref<16x32xf32, #tpu.memory_space<vmem>>, %arg6: memref<16x32xf32, #tpu.memory_space<vmem>>) attributes {dimension_semantics = [#tpu.dimension_semantics<parallel>, #tpu.dimension_semantics<parallel>], iteration_bounds = array<i64: 1, 1>, scalar_prefetch = 0 : i64, scratch_operands = 0 : i64, tpu.core_type = #tpu.core_type<tc>, window_params = [{transform_indices = @transform_0, window_bounds = array<i64: 16, 32>}, {transform_indices = @transform_1, window_bounds = array<i64: 32, 32>}, {transform_indices = @transform_2, window_bounds = array<i64: 1, 32>}, {transform_indices = @transform_3, window_bounds = array<i64: 16, 32>}, {transform_indices = @transform_4, window_bounds = array<i64: 16, 32>}]} {
    %c0 = arith.constant 0 : index
    %c0_0 = arith.constant 0 : index
    %0 = vector.load %arg2[%c0, %c0_0] : memref<16x32xf32, #tpu.memory_space<vmem>>, vector<16x32xf32>
    %c0_1 = arith.constant 0 : index
    %c0_2 = arith.constant 0 : index
    %1 = vector.load %arg3[%c0_1, %c0_2] : memref<32x32xf32, #tpu.memory_space<vmem>>, vector<32x32xf32>
    %cst = arith.constant dense<0.000000e+00> : vector<16x32xf32>
    %2 = tpu.matmul %0, %1, %cst {dimension_numbers = #tpu.dot_dimension_numbers<[1], [0], [0], [1], [0, 0, 1, 1], [], []>} : vector<16x32xf32>, vector<32x32xf32>, vector<16x32xf32> -> vector<16x32xf32>
    %c0_3 = arith.constant 0 : index
    %c0_4 = arith.constant 0 : index
    %3 = vector.load %arg4[%c0_3, %c0_4] : memref<1x32xf32, #tpu.memory_space<vmem>>, vector<1x32xf32>
    %4 = vector.broadcast %3 : vector<1x32xf32> to vector<16x32xf32>
    %5 = arith.addf %2, %4 : vector<16x32xf32>
    %c0_5 = arith.constant 0 : index
    %c0_6 = arith.constant 0 : index
    %6 = vector.load %arg5[%c0_5, %c0_6] : memref<16x32xf32, #tpu.memory_space<vmem>>, vector<16x32xf32>
    %7 = arith.addf %5, %6 : vector<16x32xf32>
    %c0_7 = arith.constant 0 : index
    %c0_8 = arith.constant 0 : index
    %8 = vector.load %arg6[%c0_7, %c0_8] : memref<16x32xf32, #tpu.memory_space<vmem>>, vector<16x32xf32>
    tpu.vector_store %arg6[%c0_7, %c0_8], %7 {strides = array<i32>} : memref<16x32xf32, #tpu.memory_space<vmem>>, vector<16x32xf32>,
    return
  }
  func.func @transform_0(%arg0: i32, %arg1: i32) -> (i32, i32) {
    %c0_i32 = arith.constant 0 : i32
    %c0_i32_0 = arith.constant 0 : i32
    return %arg0, %c0_i32 : i32, i32
  }
  func.func @transform_1(%arg0: i32, %arg1: i32) -> (i32, i32) {
    %c0_i32 = arith.constant 0 : i32
    %c0_i32_0 = arith.constant 0 : i32
    return %c0_i32, %arg1 : i32, i32
  }
  func.func @transform_2(%arg0: i32, %arg1: i32) -> (i32, i32) {
    %c0_i32 = arith.constant 0 : i32
    %c0_i32_0 = arith.constant 0 : i32
    return %c0_i32, %arg1 : i32, i32
  }
  func.func @transform_3(%arg0: i32, %arg1: i32) -> (i32, i32) {
    %c0_i32 = arith.constant 0 : i32
    return %arg0, %arg1 : i32, i32
  }
  func.func @transform_4(%arg0: i32, %arg1: i32) -> (i32, i32) {
    %c0_i32 = arith.constant 0 : i32
    return %arg0, %arg1 : i32, i32
  }
}

module attributes {stable_mosaic.version = 11 : i64} {
  func.func @_fused_linear_kernel(%arg0: i32, %arg1: i32, %arg2: memref<16x32xf32, #tpu.memory_space<vmem>>, %arg3: memref<1x32xf32, #tpu.memory_space<vmem>>, %arg4: memref<1x32xf32, #tpu.memory_space<vmem>>, %arg5: memref<32x64xf32, #tpu.memory_space<vmem>>, %arg6: memref<1x64xf32, #tpu.memory_space<vmem>>, %arg7: memref<16x64xf32, #tpu.memory_space<vmem>>) attributes {dimension_semantics = [#tpu.dimension_semantics<parallel>, #tpu.dimension_semantics<parallel>], iteration_bounds = array<i64: 1, 1>, scalar_prefetch = 0 : i64, scratch_operands = 0 : i64, tpu.core_type = #tpu.core_type<tc>, window_params = [{transform_indices = @transform_0, window_bounds = array<i64: 16, 32>}, {pipeline_mode = #tpu.pipeline_mode<synchronous>, transform_indices = @transform_1, window_bounds = array<i64: 1, 32>}, {pipeline_mode = #tpu.pipeline_mode<synchronous>, transform_indices = @transform_2, window_bounds = array<i64: 1, 32>}, {transform_indices = @transform_3, window_bounds = array<i64: 32, 64>}, {transform_indices = @transform_4, window_bounds = array<i64: 1, 64>}, {transform_indices = @transform_5, window_bounds = array<i64: 16, 64>}]} {
    %c0 = arith.constant 0 : index
    %c0_0 = arith.constant 0 : index
    %0 = vector.load %arg2[%c0, %c0_0] : memref<16x32xf32, #tpu.memory_space<vmem>>, vector<16x32xf32>
    %cst = arith.constant dense<0.000000e+00> : vector<16xf32>
    %1 = vector.multi_reduction <add>, %0, %cst [1] : vector<16x32xf32> to vector<16xf32>
    %2 = vector.shape_cast %1 : vector<16xf32> to vector<16x1xf32>
    %cst_1 = arith.constant 3.200000e+01 : f32
    %3 = vector.broadcast %cst_1 : f32 to vector<16x1xf32>
    %4 = arith.divf %2, %3 : vector<16x1xf32>
    %5 = vector.broadcast %4 : vector<16x1xf32> to vector<16x32xf32>
    %6 = arith.subf %0, %5 : vector<16x32xf32>
    %7 = arith.mulf %6, %6 : vector<16x32xf32>
    %cst_2 = arith.constant dense<0.000000e+00> : vector<16xf32>
    %8 = vector.multi_reduction <add>, %7, %cst_2 [1] : vector<16x32xf32> to vector<16xf32>
    %9 = vector.shape_cast %8 : vector<16xf32> to vector<16x1xf32>
    %cst_3 = arith.constant 3.100000e+01 : f32
    %10 = vector.broadcast %cst_3 : f32 to vector<16x1xf32>
    %11 = arith.divf %9, %10 : vector<16x1xf32>
    %12 = math.sqrt %11 : vector<16x1xf32>
    %cst_4 = arith.constant 1.000000e-07 : f32
    %13 = vector.broadcast %cst_4 : f32 to vector<16x1xf32>
    %14 = arith.addf %12, %13 : vector<16x1xf32>
    %15 = tpu.reciprocal %14 : vector<16x1xf32> -> vector<16x1xf32>
    %c0_5 = arith.constant 0 : index
    %c0_6 = arith.constant 0 : index
    %16 = vector.load %arg3[%c0_5, %c0_6] : memref<1x32xf32, #tpu.memory_space<vmem>>, vector<1x32xf32>
    %17 = vector.broadcast %16 : vector<1x32xf32> to vector<16x32xf32>
    %18 = arith.mulf %17, %6 : vector<16x32xf32>
    %19 = vector.broadcast %15 : vector<16x1xf32> to vector<16x32xf32>
    %20 = arith.mulf %18, %19 : vector<16x32xf32>
    %c0_7 = arith.constant 0 : index
    %c0_8 = arith.constant 0 : index
    %21 = vector.load %arg4[%c0_7, %c0_8] : memref<1x32xf32, #tpu.memory_space<vmem>>, vector<1x32xf32>
    %22 = vector.broadcast %21 : vector<1x32xf32> to vector<16x32xf32>
    %23 = arith.addf %20, %22 : vector<16x32xf32>
    %c0_9 = arith.constant 0 : index
    %c0_10 = arith.constant 0 : index
    %24 = vector.load %arg5[%c0_9, %c0_10] : memref<32x64xf32, #tpu.memory_space<vmem>>, vector<32x64xf32>
    %cst_11 = arith.constant dense<0.000000e+00> : vector<16x64xf32>
    %25 = tpu.matmul %23, %24, %cst_11 {dimension_numbers = #tpu.dot_dimension_numbers<[1], [0], [0], [1], [0, 0, 1, 1], [], []>} : vector<16x32xf32>, vector<32x64xf32>, vector<16x64xf32> -> vector<16x64xf32>
    %c0_12 = arith.constant 0 : index
    %c0_13 = arith.constant 0 : index
    %26 = vector.load %arg6[%c0_12, %c0_13] : memref<1x64xf32, #tpu.memory_space<vmem>>, vector<1x64xf32>
    %27 = vector.broadcast %26 : vector<1x64xf32> to vector<16x64xf32>
    %28 = arith.addf %25, %27 : vector<16x64xf32>
    %cst_14 = arith.constant 0.000000e+00 : f32
    %29 = vector.broadcast %cst_14 : f32 to vector<16x64xf32>
    %30 = arith.maximumf %28, %29 : vector<16x64xf32>
    %c0_15 = arith.constant 0 : index
    %c0_16 = arith.constant 0 : index
    %31 = vector.load %arg7[%c0_15, %c0_16] : memref<16x64xf32, #tpu.memory_space<vmem>>, vector<16x64xf32>
    tpu.vector_store %arg7[%c0_15, %c0_16], %30 {strides = array<i32>} : memref<16x64xf32, #tpu.memory_space<vmem>>, vector<16x64xf32>,
    return
  }
  func.func @transform_0(%arg0: i32, %arg1: i32) -> (i32, i32) {
    %c0_i32 = arith.constant 0 : i32
    %c0_i32_0 = arith.constant 0 : i32
    return %arg0, %c0_i32 : i32, i32
  }
  func.func @transform_1(%arg0: i32, %arg1: i32) -> (i32, i32) {
    %c0_i32 = arith.constant 0 : i32
    %c0_i32_0 = arith.constant 0 : i32
    %c0_i32_1 = arith.constant 0 : i32
    return %c0_i32, %c0_i32_0 : i32, i32
  }
  func.func @transform_2(%arg0: i32, %arg1: i32) -> (i32, i32) {
    %c0_i32 = arith.constant 0 : i32
    %c0_i32_0 = arith.constant 0 : i32
    %c0_i32_1 = arith.constant 0 : i32
    return %c0_i32, %c0_i32_0 : i32, i32
  }
  func.func @transform_3(%arg0: i32, %arg1: i32) -> (i32, i32) {
    %c0_i32 = arith.constant 0 : i32
    %c0_i32_0 = arith.constant 0 : i32
    return %c0_i32, %arg1 : i32, i32
  }
  func.func @transform_4(%arg0: i32, %arg1: i32) -> (i32, i32) {
    %c0_i32 = arith.constant 0 : i32
    %c0_i32_0 = arith.constant 0 : i32
    return %c0_i32, %arg1 : i32, i32
  }
  func.func @transform_5(%arg0: i32, %arg1: i32) -> (i32, i32) {
    %c0_i32 = arith.constant 0 : i32
    return %arg0, %arg1 : i32, i32
  }
}

module attributes {stable_mosaic.version = 11 : i64} {
  func.func @_fused_linear_kernel(%arg0: i32, %arg1: i32, %arg2: memref<16x64xf32, #tpu.memory_space<vmem>>, %arg3: memref<64x32xf32, #tpu.memory_space<vmem>>, %arg4: memref<1x32xf32, #tpu.memory_space<vmem>>, %arg5: memref<16x32xf32, #tpu.memory_space<vmem>>, %arg6: memref<16x32xf32, #tpu.memory_space<vmem>>) attributes {dimension_semantics = [#tpu.dimension_semantics<parallel>, #tpu.dimension_semantics<parallel>], iteration_bounds = array<i64: 1, 1>, scalar_prefetch = 0 : i64, scratch_operands = 0 : i64, tpu.core_type = #tpu.core_type<tc>, window_params = [{transform_indices = @transform_0, window_bounds = array<i64: 16, 64>}, {transform_indices = @transform_1, window_bounds = array<i64: 64, 32>}, {transform_indices = @transform_2, window_bounds = array<i64: 1, 32>}, {transform_indices = @transform_3, window_bounds = array<i64: 16, 32>}, {transform_indices = @transform_4, window_bounds = array<i64: 16, 32>}]} {
    %c0 = arith.constant 0 : index
    %c0_0 = arith.constant 0 : index
    %0 = vector.load %arg2[%c0, %c0_0] : memref<16x64xf32, #tpu.memory_space<vmem>>, vector<16x64xf32>
    %c0_1 = arith.constant 0 : index
    %c0_2 = arith.constant 0 : index
    %1 = vector.load %arg3[%c0_1, %c0_2] : memref<64x32xf32, #tpu.memory_space<vmem>>, vector<64x32xf32>
    %cst = arith.constant dense<0.000000e+00> : vector<16x32xf32>
    %2 = tpu.matmul %0, %1, %cst {dimension_numbers = #tpu.dot_dimension_numbers<[1], [0], [0], [1], [0, 0, 1, 1], [], []>} : vector<16x64xf32>, vector<64x32xf32>, vector<16x32xf32> -> vector<16x32xf32>
    %c0_3 = arith.constant 0 : index
    %c0_4 = arith.constant 0 : index
    %3 = vector.load %arg4[%c0_3, %c0_4] : memref<1x32xf32, #tpu.memory_space<vmem>>, vector<1x32xf32>
    %4 = vector.broadcast %3 : vector<1x32xf32> to vector<16x32xf32>
    %5 = arith.addf %2, %4 : vector<16x32xf32>
    %c0_5 = arith.constant 0 : index
    %c0_6 = arith.constant 0 : index
    %6 = vector.load %arg5[%c0_5, %c0_6] : memref<16x32xf32, #tpu.memory_space<vmem>>, vector<16x32xf32>
    %7 = arith.addf %5, %6 : vector<16x32xf32>
    %c0_7 = arith.constant 0 : index
    %c0_8 = arith.constant 0 : index
    %8 = vector.load %arg6[%c0_7, %c0_8] : memref<16x32xf32, #tpu.memory_space<vmem>>, vector<16x32xf32>
    tpu.vector_store %arg6[%c0_7, %c0_8], %7 {strides = array<i32>} : memref<16x32xf32, #tpu.memory_space<vmem>>, vector<16x32xf32>,
    return
  }
  func.func @transform_0(%arg0: i32, %arg1: i32) -> (i32, i32) {
    %c0_i32 = arith.constant 0 : i32
    %c0_i32_0 = arith.constant 0 : i32
    return %arg0, %c0_i32 : i32, i32
  }
  func.func @transform_1(%arg0: i32, %arg1: i32) -> (i32, i32) {
    %c0_i32 = arith.constant 0 : i32
    %c0_i32_0 = arith.constant 0 : i32
    return %c0_i32, %arg1 : i32, i32
  }
  func.func @transform_2(%arg0: i32, %arg1: i32) -> (i32, i32) {
    %c0_i32 = arith.constant 0 : i32
    %c0_i32_0 = arith.constant 0 : i32
    return %c0_i32, %arg1 : i32, i32
  }
  func.func @transform_3(%arg0: i32, %arg1: i32) -> (i32, i32) {
    %c0_i32 = arith.constant 0 : i32
    return %arg0, %arg1 : i32, i32
  }
  func.func @transform_4(%arg0: i32, %arg1: i32) -> (i32, i32) {
    %c0_i32 = arith.constant 0 : i32
    return %arg0, %arg1 : i32, i32
  }
}

</mosaic_0001>

<bundles_post_ra>
// kernel: encoder_layer_forward.5
= control target key start
LH: loop header
LB: loop body
LE: loop exit
PB: predicated region body
PF: predicated region fallthrough
CT: control target
= control target key end

     0   :  { %10 = vsyncpa [#allocation3], 0  ;;  %s355_s0 = inlined_call_operand.hbm [shape: f32[16,32], index: 0, kind: input, shape index: {}]   ;;  %s356_s1 = inlined_call_operand.vmem [shape: f32[1,32], index: 1, kind: input, shape index: {}]   ;;  %s357_s2 = inlined_call_operand.vmem [shape: f32[1,32], index: 2, kind: input, shape index: {}]   ;;  %s358_s3 = inlined_call_operand.hbm [shape: f32[32,96], index: 3, kind: input, shape index: {}]   ;;  %s359_s4 = inlined_call_operand.vmem [shape: f32[1,96], index: 4, kind: input, shape index: {}]   ;;  %s360_s5 = inlined_call_operand.vmem [shape: f32[16,96], index: 5, kind: output, shape index: {}]  }
   0x1   :  { %s16_s20 = sshll.u32 %s355_s0, 4  ;;  %s17_s20 = int_to_ptr.hbm [resolvable:$true] %s16_s20 }
   0x2   :  { %11 = vsyncpa [#allocation5], 0  ;;  %s282_s21 = smov [#allocation2]   ;;  %s33_s25 = sshll.u32 %s358_s3, 4  ;;  %s34_s25 = int_to_ptr.hbm [resolvable:$true] %s33_s25 }
   0x3   :  { %s18_s22 = sshll.u32 %s282_s21, 4  ;;  %s283_s26 = smov 128   ;;  %s19_s22 = int_to_ptr.vmem [resolvable:$true] %s18_s22 }
   0x4   :  { %s284_s27 = smov 8   ;;  %s285_s28 = smov [#allocation4]  }
   0x5   :  { %24 = dma.hbm_to_vmem [thread:$0]  %s17_s20, 256, %s19_s22, [#allocation3], %s283_s26, %s283_s26, %s284_s27  }
   0x6   :  { %s35_s29 = sshll.u32 %s285_s28, 4  ;;  %s36_s29 = int_to_ptr.vmem [resolvable:$true] %s35_s29 }
   0x7   :  { %41 = dma.hbm_to_vmem [thread:$0]  %s34_s25, 512, %s36_s29, [#allocation5], %s283_s26, %s283_s26, %s284_s27  }
   0x8   :  { %278 = dma.done.wait [#allocation3], 256  }
   0x9   :  { %279 = vsyncadd [#allocation3], 4294967040 }
   0xa   :  { %280 = dma.done.wait [#allocation5], 512  }
   0xb   :  { %281 = vsyncadd [#allocation5], 4294966784  ;;  %vm54_vm0 = vcmask 261120   ;;  %v52_v0 = vld [vmem:[#allocation2] sm:$0xff]  ;;  %v53_v2 = vld [vmem:[#allocation2 + $0x8] sm:$0xff]  ;;  %v286_v4 = vmov 32.0  }
   0xc   :  { %v55_v1 = vsel %vm54_vm0, %v52_v0, 0.0  ;;  %v58_v3 = vsel %vm54_vm0, %v53_v2, 0.0  ;;  %218 = vrcp.f32 %v286_v4  ;;  %v287_v21 = vmov 31.0   ;;  %v160_v27 = vld [vmem:[#allocation4 + $0x18] sm:$0xff]  ;;  %v159_v28 = vld [vmem:[#allocation4 + $0x10] sm:$0xff]  ;;  %v158_v30 = vld [vmem:[#allocation4 + $0x8] sm:$0xff] }
   0xd   :  { %56 = vadd.xlane.f32.xlu0 %v55_v1  ;;  %220 = vrcp.f32 %v287_v21  ;;  %183 = vmatpush.msra.mxu0 %v160_v27  ;;  %v157_v32 = vld [vmem:[#allocation4] sm:$0xff]  ;;  %v215_v62 = vld [vmem:[%s356_s1] ss:$0 sm:$0xff]  ;;  %vm194_vm15 = vcmask 785408  }
   0xe   :  { %205 = vmatpush.msra.mxu1 %v160_v27 }
   0xf   :  { %184 = vmatpush.msra.mxu0 %v159_v28 }
  0x10   :  { %206 = vmatpush.msra.mxu1 %v159_v28 }
  0x11   :  { %185 = vmatpush.msra.mxu0 %v158_v30 }
  0x12   :  { %v219_v5 = vpop.eup %218  ;;  %207 = vmatpush.msra.mxu1 %v158_v30 }
  0x13   :  { %v62_v6 = vmul.f32 32.0, %v219_v5  ;;  %vm66_vm1 = vweird.f32 %v219_v5  ;;  %v221_v22 = vpop.eup %220  ;;  %186 = vmatpush.msra.mxu0 %v157_v32 }
  0x14   :  { %v81_v23 = vmul.f32 31.0, %v221_v22  ;;  %vm85_vm2 = vweird.f32 %v221_v22  ;;  %208 = vmatpush.msra.mxu1 %v157_v32 }
  0x15   :  { %59 = vadd.xlane.f32.xlu0 %v58_v3  ;;  %v63_v7 = vsub.f32 1.0, %v62_v6  ;;  %v216_v6 = vld [vmem:[%s357_s2] ss:$0 sm:$0xff] }
  0x16   :  { %v82_v24 = vsub.f32 1.0, %v81_v23  ;;  %v217_v23 = vld [vmem:[%s359_s4] ss:$0 sm:$0xff] }
  0x17   :  { %v64_v8 = vmul.f32 %v219_v5, %v63_v7 }
  0x18   :  { %v83_v25 = vmul.f32 %v221_v22, %v82_v24 }
  0x19   :  { %v65_v9 = vadd.f32 %v219_v5, %v64_v8 }
  0x1a   :  { %v84_v26 = vadd.f32 %v221_v22, %v83_v25 }
  0x1b   :  { %v67_v10 = vsel %vm66_vm1, %v219_v5, %v65_v9 }
  0x1c   :  { %v86_v29 = vsel %vm85_vm2, %v221_v22, %v84_v26 }
  0x80   :  { %v57_v11 = vpop.xlane.xlu0 %56 }
  0x81   :  { %v68_v12 = vmul.f32 %v67_v10, %v57_v11 }
  0x83   :  { %v326_v13 = vsub.f32 %v52_v0, %v68_v12 }
  0x85   :  { %v72_v14 = vmul.f32 %v326_v13, %v326_v13  ;;  %v147_v4 = vmul.f32 %v215_v62, %v326_v13 }
  0x87   :  { %v74_v15 = vsel %vm54_vm0, %v72_v14, 0.0 }
  0x88   :  { %75 = vadd.xlane.f32.xlu1 %v74_v15  ;;  %v60_v16 = vpop.xlane.xlu0 %59 }
  0x89   :  { %v69_v17 = vmul.f32 %v67_v10, %v60_v16 }
  0x8b   :  { %v331_v18 = vsub.f32 %v53_v2, %v69_v17 }
  0x8d   :  { %v73_v19 = vmul.f32 %v331_v18, %v331_v18  ;;  %v148_v17 = vmul.f32 %v215_v62, %v331_v18 }
  0x8f   :  { %v77_v20 = vsel %vm54_vm0, %v73_v19, 0.0 }
  0x90   :  { %78 = vadd.xlane.f32.xlu1 %v77_v20 }
  0xfb   :  { %v76_v31 = vpop.xlane.xlu1 %75 }
  0xfc   :  { %v87_v33 = vmul.f32 %v86_v29, %v76_v31 }
  0xfe   :  { %222 = vrsqrt.f32 %v87_v33  ;;  %vm96_vm3 = vcmp.eq.f32.partialorder %v87_v33, inf  ;;  %v99_v46 = vand.u32 2147483648, %v87_v33  ;;  %vm98_vm4 = vcmp.eq.f32.partialorder %v87_v33, 0.0 }
 0x103   :  { %v79_v34 = vpop.xlane.xlu1 %78 }
 0x104   :  { %v223_v35 = vpop.eup %222  ;;  %v88_v36 = vmul.f32 %v86_v29, %v79_v34 }
 0x105   :  { %v90_v37 = vmul.f32 %v223_v35, %v87_v33 }
 0x106   :  { %224 = vrsqrt.f32 %v88_v36  ;;  %vm108_vm5 = vcmp.eq.f32.partialorder %v88_v36, inf  ;;  %v111_v54 = vand.u32 2147483648, %v88_v36  ;;  %vm110_vm6 = vcmp.eq.f32.partialorder %v88_v36, 0.0 }
 0x107   :  { %v91_v38 = vmul.f32 %v223_v35, %v90_v37 }
 0x109   :  { %v92_v39 = vmul.f32 0.5, %v91_v38 }
 0x10b   :  { %v93_v40 = vsub.f32 1.5, %v92_v39 }
 0x10c   :  { %v225_v41 = vpop.eup %224 }
 0x10d   :  { %v94_v42 = vmul.f32 %v223_v35, %v93_v40  ;;  %v102_v43 = vmul.f32 %v225_v41, %v88_v36 }
 0x10f   :  { %v95_v44 = vmul.f32 %v94_v42, %v87_v33  ;;  %v103_v45 = vmul.f32 %v225_v41, %v102_v43 }
 0x111   :  { %v104_v47 = vmul.f32 0.5, %v103_v45  ;;  %v97_v48 = vsel %vm96_vm3, %v87_v33, %v95_v44 }
 0x112   :  { %v100_v49 = vsel %vm98_vm4, %v99_v46, %v97_v48 }
 0x113   :  { %v105_v50 = vsub.f32 1.5, %v104_v47  ;;  %v113_v51 = vadd.f32 1e-07, %v100_v49 }
 0x115   :  { %v106_v52 = vmul.f32 %v225_v41, %v105_v50  ;;  %226 = vrcp.f32 %v113_v51  ;;  %v126_v61 = vand.u32 2147483648, %v113_v51  ;;  %v124_v0 = vand.u32 2147483647, %v113_v51 }
 0x116   :  { %vm120_vm8 = vweird.f32 %v113_v51 }
 0x117   :  { %v107_v53 = vmul.f32 %v106_v52, %v88_v36  ;;  %v127_v3 = vor.u32 1.1754944e-38, %v126_v61  ;;  %vm125_vm10 = vcmp.eq.f32.partialorder %v124_v0, 8.507059e+37 }
 0x119   :  { %v109_v55 = vsel %vm108_vm5, %v88_v36, %v107_v53 }
 0x11a   :  { %v112_v56 = vsel %vm110_vm6, %v111_v54, %v109_v55 }
 0x11b   :  { %v227_v57 = vpop.eup %226  ;;  %v114_v58 = vadd.f32 1e-07, %v112_v56 }
 0x11c   :  { %v116_v59 = vmul.f32 %v227_v57, %v113_v51  ;;  %vm121_vm7 = vweird.f32 %v227_v57 }
 0x11d   :  { %228 = vrcp.f32 %v114_v58  ;;  %vm122_vm9 = vmor %vm120_vm8, %vm121_vm7  ;;  %v140_v11 = vand.u32 2147483648, %v114_v58  ;;  %v138_v15 = vand.u32 2147483647, %v114_v58  ;;  %vm134_vm12 = vweird.f32 %v114_v58 }
 0x11e   :  { %v117_v60 = vsub.f32 1.0, %v116_v59 }
 0x11f   :  { %v141_v13 = vor.u32 1.1754944e-38, %v140_v11  ;;  %vm139_vm14 = vcmp.eq.f32.partialorder %v138_v15, 8.507059e+37 }
 0x120   :  { %v118_v63 = vmul.f32 %v227_v57, %v117_v60 }
 0x122   :  { %v119_v1 = vadd.f32 %v227_v57, %v118_v63 }
 0x123   :  { %v229_v2 = vpop.eup %228 }
 0x124   :  { %v123_v5 = vsel %vm122_vm9, %v227_v57, %v119_v1  ;;  %v130_v7 = vmul.f32 %v229_v2, %v114_v58  ;;  %vm135_vm11 = vweird.f32 %v229_v2 }
 0x125   :  { %v128_v8 = vsel %vm125_vm10, %v127_v3, %v123_v5  ;;  %vm136_vm13 = vmor %vm134_vm12, %vm135_vm11 }
 0x126   :  { %v149_v9 = vmul.f32 %v147_v4, %v128_v8  ;;  %v131_v10 = vsub.f32 1.0, %v130_v7 }
 0x128   :  { %v155_v12 = vadd.f32 %v216_v6, %v149_v9  ;;  %v132_v14 = vmul.f32 %v229_v2, %v131_v10 }
 0x12a   :  { %203 = vmatmul.msk.f32.vlgmr.msra.gmra.mxu0 %vm54_vm0, %v155_v12  ;;  %v133_v16 = vadd.f32 %v229_v2, %v132_v14 }
 0x12c   :  { %v137_v19 = vsel %vm136_vm13, %v229_v2, %v133_v16 }
 0x12d   :  { %v142_v20 = vsel %vm139_vm14, %v141_v13, %v137_v19 }
 0x12e   :  { %v150_v21 = vmul.f32 %v148_v17, %v142_v20 }
 0x130   :  { %v156_v22 = vadd.f32 %v216_v6, %v150_v21 }
 0x132   :  { %204 = vmatmul.msk.f32.vlgmr.msra.gmra.mxu1 %vm54_vm0, %v156_v22 }
 0x1a7   :  { %v188_v24 = vpop.f32.mrf.mxu0 }
 0x1a8   :  { %v189_v25 = vadd.f32 %v217_v23, %v188_v24 }
 0x1aa   :  { %195 = vst.msk [vmem:[%s360_s5] sm:$0xff] %vm194_vm15, %v189_v25 }
 0x1af   :  { %v191_v26 = vpop.f32.mrf.mxu1 }
 0x1b0   :  { %v192_v18 = vadd.f32 %v217_v23, %v191_v26 }
 0x1b2   :  { %196 = vst.msk [vmem:[%s360_s5 + $0x8] sm:$0xff] %vm194_vm15, %v192_v18 }
 0x1b3   :  { %201 = vsyncpa [#allocation3], 1 }
 0x1b4   :  { %202 = vsyncpa [#allocation5], 1 }

// kernel: encoder_layer_forward.6
= control target key start
LH: loop header
LB: loop body
LE: loop exit
PB: predicated region body
PF: predicated region fallthrough
CT: control target
= control target key end

     0   :  { %s651_s15 = smov 0   ;;  %s653_s16 = smov 0   ;;  %s723_s0 = inlined_call_operand.vmem [shape: f32[2,4,8,8], index: 0, kind: input, shape index: {}]   ;;  %s724_s1 = inlined_call_operand.vmem [shape: f32[2,4,8,8], index: 1, kind: input, shape index: {}]   ;;  %s725_s2 = inlined_call_operand.vmem [shape: f32[2,4,8,8], index: 2, kind: input, shape index: {}]   ;;  %s726_s3 = inlined_call_operand.vmem [shape: f32[2,8,8], index: 3, kind: input, shape index: {}]   ;;  %s727_s4 = inlined_call_operand.vmem [shape: f32[2,4,8,8], index: 4, kind: output, shape index: {}]  }
   0x1   :  { %s655_s17 = smov 0   ;;  %s657_s18 = smov 0  }
   0x2   :  { %s659_s19 = smov 0  }
   0x3 LB: > { %s23_s20 = sadd.s32 1, %s616_s17  ;;  %s26_s21 = sadd.s32 1, %s620_s18  ;;  %s624_s19 = sphi %s659_s19, %s14_s19   ;;  %s620_s18 = sphi %s657_s18, %s731_s18   ;;  %s616_s17 = sphi %s655_s17, %s730_s17   ;;  %s612_s16 = sphi %s653_s16, %s729_s16   ;;  %s608_s15 = sphi %s651_s15, %s728_s15  }
   0x4   : > { %p24_p0 = scmp.ge.s32.totalorder %s23_s20, 4  ;;  %p527_p1 = scmp.ge.s32.totalorder %s624_s19, 1 }
   0x5   : > { %p220_p2 = scmp.lt.s32.totalorder %s624_s19, 9 }
   0x6   : > { %s733_s20 = smov (%p24_p0, %s23_s20), 0  ;;  %s735_s21 = smov (!%p24_p0, %s26_s21), %s620_s18 }
   0x7   : > { %p221_p3 = pnand %p527_p1, %p220_p2  ;;  %p28_p4 = scmp.ge.s32.totalorder %s735_s21, 2 }
   0x8   : > { %p272_p5 = scmp.lt.s32.totalorder (!%p221_p3), %s612_s16, 1  ;;  %p274_p6 = scmp.lt.s32.totalorder (!%p221_p3), %s608_s15, 3 }
   0x9   : > { %s737_s21 = smov (%p28_p4, %s735_s21), 0  ;;  %224 = sbr.rel (%p221_p3) target bundleno = 544 (0x220), region = 36 }
   0xe   : > { %s739_s16 = smov (!%p272_p5, %s612_s16), 1  ;;  %s741_s15 = smov (!%p274_p6, %s608_s15), 3  ;;  %vm311_vm0 = vcmask 64512  }
   0xf   : > { %s528_s22 = sshll.u32 %s739_s16, 2  ;;  %s534_s5 = sshll.u32 %s739_s16, 3 }
  0x10   : > { %s277_s23 = sadd.s32 %s528_s22, %s741_s15  ;;  %s299_s8 = scalar_lea.vmem %s726_s3, %s534_s5 }
  0x11   : > { %s681_s24 = sshll.u32 %s277_s23, 3  ;;  %v339_v3 = vld [vmem:[%s299_s8] sm:$0xff] }
  0x12   : > { %s287_s27 = scalar_lea.vmem %s724_s1, %s681_s24  ;;  %s279_s30 = scalar_lea.vmem %s723_s0, %s681_s24 }
  0x13   : > { %v309_v0 = vld [vmem:[%s287_s27] sm:$0xff]  ;;  %s295_s11 = scalar_lea.vmem %s725_s2, %s681_s24  ;;  %s307_s14 = scalar_lea.vmem %s727_s4, %s681_s24 }
  0x14   : > { %537 = vmatpush.xpose.msk.msra.mxu0 %vm311_vm0, %v309_v0  ;;  %v308_v1 = vld [vmem:[%s279_s30] sm:$0xff] }
  0x15   : > { %v310_v12 = vld [vmem:[%s295_s11] sm:$0xff] }
  0x16   : > { %383 = vmatpush.msra.mxu1 %v310_v12 }
  0x17   : > { %538 = vmatmul.msk.f32.vlgmr.msra.gmra.mxu0 %vm311_vm0, %v308_v1 }
  0x94   : > { %v335_v2 = vpop.f32.mrf.mxu0 }
  0x95   : > { %v338_v4 = vmul.f32 0.35355338, %v335_v2 }
  0x97   : > { %v340_v5 = vadd.f32 %v339_v3, %v338_v4 }
  0x99   : > { %v341_v6 = vsel %vm311_vm0, %v340_v5, -inf }
  0x9a   : > { %342 = vmax.xlane.f32.xlu0 %v341_v6 }
 0x10d   : > { %v343_v7 = vpop.xlane.xlu0 %342 }
 0x10e   : > { %v344_v8 = vsub.f32 %v340_v5, %v343_v7 }
 0x110   : > { %v345_v9 = vmul.f32 1.442695, %v344_v8 }
 0x112   : > { %582 = vpow2.f32 %v345_v9 }
 0x118   : > { %v583_v10 = vpop.eup %582 }
 0x119   : > { %v347_v11 = vsel %vm311_vm0, %v583_v10, 0.0 }
 0x11a   : > { %348 = vadd.xlane.f32.xlu0 %v347_v11 }
 0x18d   : > { %v349_v13 = vpop.xlane.xlu0 %348 }
 0x18e   : > { %584 = vrcp.f32 %v349_v13  ;;  %v361_v17 = vand.u32 2147483648, %v349_v13  ;;  %v359_v19 = vand.u32 2147483647, %v349_v13  ;;  %vm355_vm2 = vweird.f32 %v349_v13 }
 0x190   : > { %v362_v21 = vor.u32 1.1754944e-38, %v361_v17  ;;  %vm360_vm4 = vcmp.eq.f32.partialorder %v359_v19, 8.507059e+37 }
 0x194   : > { %v585_v14 = vpop.eup %584 }
 0x195   : > { %v351_v15 = vmul.f32 %v585_v14, %v349_v13  ;;  %vm356_vm1 = vweird.f32 %v585_v14 }
 0x196   : > { %vm357_vm3 = vmor %vm355_vm2, %vm356_vm1 }
 0x197   : > { %v352_v16 = vsub.f32 1.0, %v351_v15 }
 0x199   : > { %v353_v18 = vmul.f32 %v585_v14, %v352_v16 }
 0x19b   : > { %v354_v20 = vadd.f32 %v585_v14, %v353_v18 }
 0x19d   : > { %v358_v22 = vsel %vm357_vm3, %v585_v14, %v354_v20 }
 0x19e   : > { %v363_v23 = vsel %vm360_vm4, %v362_v21, %v358_v22 }
 0x19f   : > { %v364_v24 = vmul.f32 %v583_v10, %v363_v23 }
 0x1a1   : > { %539 = vmatmul.msk.f32.vlgmr.msra.gmra.mxu1 %vm311_vm0, %v364_v24 }
 0x21e   : > { %v385_v25 = vpop.f32.mrf.mxu1 }
 0x21f   : > { %388 = vst.msk [vmem:[%s307_s14] sm:$0xff] %vm311_vm0, %v385_v25 }
 0x220 PF: > { %s14_s19 = sadd.s32 1, %s624_s19   ;;  %s728_s15 = smov %s616_s17 }
 0x221   : > { %p11_p7 = scmp.ge.s32.totalorder %s14_s19, 10   ;;  %s729_s16 = smov %s620_s18 }
 0x222   : > { %s730_s17 = smov %s733_s20  ;;  %s731_s18 = smov %s737_s21 }
 0x223   :  { %13 = sbr.rel (!%p11_p7) target bundleno = 3 (0x3), region = 75 }

// kernel: encoder_layer_forward.7
= control target key start
LH: loop header
LB: loop body
LE: loop exit
PB: predicated region body
PF: predicated region fallthrough
CT: control target
= control target key end

     0   :  { %vm27_vm0 = vcmask 261120   ;;  %s136_s1 = inlined_call_operand.vmem [shape: f32[32,32], index: 1, kind: input, shape index: {}]   ;;  %s137_s2 = inlined_call_operand.vmem [shape: f32[1,32], index: 2, kind: input, shape index: {}]   ;;  %s138_s0 = inlined_call_operand.vmem [shape: f32[16,32], index: 0, kind: input, shape index: {}]   ;;  %s139_s3 = inlined_call_operand.vmem [shape: f32[16,32], index: 3, kind: input, shape index: {}]   ;;  %s140_s4 = inlined_call_operand.vmem [shape: f32[16,32], index: 4, kind: output, shape index: {}]  }
   0x1   :  { %v22_v0 = vld [vmem:[%s136_s1 + $0x18] sm:$0xff]  ;;  %v21_v1 = vld [vmem:[%s136_s1 + $0x10] sm:$0xff]  ;;  %v20_v2 = vld [vmem:[%s136_s1 + $0x8] sm:$0xff] }
   0x2   :  { %46 = vmatpush.msra.mxu0 %v22_v0  ;;  %69 = vmatpush.msra.mxu1 %v22_v0  ;;  %v19_v3 = vld [vmem:[%s136_s1] sm:$0xff]  ;;  %v18_v5 = vld [vmem:[%s138_s0 + $0x8] sm:$0xff] }
   0x3   :  { %v17_v4 = vld [vmem:[%s138_s0] sm:$0xff]  ;;  %v58_v10 = vld [vmem:[%s139_s3 + $0x8] sm:$0xff] }
   0x4   :  { %47 = vmatpush.msra.mxu0 %v21_v1  ;;  %70 = vmatpush.msra.mxu1 %v21_v1  ;;  %v73_v6 = vld [vmem:[%s137_s2] ss:$0 sm:$0xff] }
   0x5   :  { %v57_v8 = vld [vmem:[%s139_s3] sm:$0xff] }
   0x6   :  { %48 = vmatpush.msra.mxu0 %v20_v2  ;;  %71 = vmatpush.msra.mxu1 %v20_v2 }
   0x8   :  { %49 = vmatpush.msra.mxu0 %v19_v3  ;;  %72 = vmatpush.msra.mxu1 %v19_v3 }
   0x9   :  { %67 = vmatmul.msk.f32.vlgmr.msra.gmra.mxu0 %vm27_vm0, %v17_v4  ;;  %68 = vmatmul.msk.f32.vlgmr.msra.gmra.mxu1 %vm27_vm0, %v18_v5 }
  0x86   :  { %v51_v7 = vpop.f32.mrf.mxu0  ;;  %v54_v9 = vpop.f32.mrf.mxu1 }
  0x87   :  { %v52_v11 = vadd.f32 %v73_v6, %v51_v7  ;;  %v55_v12 = vadd.f32 %v73_v6, %v54_v9 }
  0x89   :  { %v59_v13 = vadd.f32 %v57_v8, %v52_v11  ;;  %v60_v14 = vadd.f32 %v58_v10, %v55_v12 }
  0x8b   :  { %61 = vst.msk [vmem:[%s140_s4] sm:$0xff] %vm27_vm0, %v59_v13 }
  0x8c   :  { %62 = vst.msk [vmem:[%s140_s4 + $0x8] sm:$0xff] %vm27_vm0, %v60_v14 }

// kernel: encoder_layer_forward.8
= control target key start
LH: loop header
LB: loop body
LE: loop exit
PB: predicated region body
PF: predicated region fallthrough
CT: control target
= control target key end

     0   :  { %vm22_vm0 = vcmask 261120   ;;  %v194_v4 = vmov 32.0   ;;  %v195_v24 = vmov 31.0   ;;  %vm164_vm15 = vcmask 523264   ;;  %s271_s0 = inlined_call_operand.vmem [shape: f32[16,32], index: 0, kind: input, shape index: {}]   ;;  %s272_s1 = inlined_call_operand.vmem [shape: f32[1,32], index: 1, kind: input, shape index: {}]   ;;  %s273_s2 = inlined_call_operand.vmem [shape: f32[1,32], index: 2, kind: input, shape index: {}]   ;;  %s274_s4 = inlined_call_operand.vmem [shape: f32[1,64], index: 4, kind: input, shape index: {}]   ;;  %s275_s3 = inlined_call_operand.vmem [shape: f32[32,64], index: 3, kind: input, shape index: {}]   ;;  %s276_s5 = inlined_call_operand.vmem [shape: f32[16,64], index: 5, kind: output, shape index: {}]  }
   0x1   :  { %v20_v0 = vld [vmem:[%s271_s0] sm:$0xff]  ;;  %v21_v2 = vld [vmem:[%s271_s0 + $0x8] sm:$0xff]  ;;  %182 = vrcp.f32 %v194_v4  ;;  %v128_v30 = vld [vmem:[%s275_s3 + $0x18] sm:$0xff] }
   0x2   :  { %v23_v1 = vsel %vm22_vm0, %v20_v0, 0.0  ;;  %v26_v3 = vsel %vm22_vm0, %v21_v2, 0.0  ;;  %v179_v12 = vld [vmem:[%s272_s1] ss:$0 sm:$0xff]  ;;  %184 = vrcp.f32 %v195_v24  ;;  %v127_v31 = vld [vmem:[%s275_s3 + $0x10] sm:$0xff]  ;;  %151 = vmatpush.msra.mxu0 %v128_v30  ;;  %173 = vmatpush.msra.mxu1 %v128_v30  ;;  %v126_v33 = vld [vmem:[%s275_s3 + $0x8] sm:$0xff] }
   0x3   :  { %24 = vadd.xlane.f32.xlu0 %v23_v1  ;;  %v125_v35 = vld [vmem:[%s275_s3] sm:$0xff] }
   0x4   :  { %152 = vmatpush.msra.mxu0 %v127_v31  ;;  %174 = vmatpush.msra.mxu1 %v127_v31 }
   0x6   :  { %153 = vmatpush.msra.mxu0 %v126_v33  ;;  %175 = vmatpush.msra.mxu1 %v126_v33 }
   0x7   :  { %v183_v5 = vpop.eup %182 }
   0x8   :  { %v30_v6 = vmul.f32 32.0, %v183_v5  ;;  %vm34_vm1 = vweird.f32 %v183_v5  ;;  %v185_v25 = vpop.eup %184  ;;  %154 = vmatpush.msra.mxu0 %v125_v35  ;;  %176 = vmatpush.msra.mxu1 %v125_v35 }
   0x9   :  { %v49_v26 = vmul.f32 31.0, %v185_v25  ;;  %vm53_vm2 = vweird.f32 %v185_v25 }
   0xa   :  { %v31_v7 = vsub.f32 1.0, %v30_v6 }
   0xb   :  { %27 = vadd.xlane.f32.xlu0 %v26_v3  ;;  %v50_v27 = vsub.f32 1.0, %v49_v26 }
   0xc   :  { %v32_v8 = vmul.f32 %v183_v5, %v31_v7  ;;  %v180_v7 = vld [vmem:[%s273_s2] ss:$0 sm:$0xff] }
   0xd   :  { %v51_v28 = vmul.f32 %v185_v25, %v50_v27 }
   0xe   :  { %v33_v9 = vadd.f32 %v183_v5, %v32_v8 }
   0xf   :  { %v52_v29 = vadd.f32 %v185_v25, %v51_v28 }
  0x10   :  { %v35_v10 = vsel %vm34_vm1, %v183_v5, %v33_v9 }
  0x11   :  { %v54_v32 = vsel %vm53_vm2, %v185_v25, %v52_v29 }
  0x76   :  { %v25_v11 = vpop.xlane.xlu0 %24 }
  0x77   :  { %v36_v13 = vmul.f32 %v35_v10, %v25_v11 }
  0x79   :  { %v38_v14 = vsub.f32 %v20_v0, %v36_v13 }
  0x7b   :  { %v237_v15 = vmul.f32 %v179_v12, %v38_v14  ;;  %v40_v16 = vmul.f32 %v38_v14, %v38_v14 }
  0x7d   :  { %v42_v17 = vsel %vm22_vm0, %v40_v16, 0.0 }
  0x7e   :  { %43 = vadd.xlane.f32.xlu1 %v42_v17  ;;  %v28_v18 = vpop.xlane.xlu0 %27 }
  0x7f   :  { %v37_v19 = vmul.f32 %v35_v10, %v28_v18 }
  0x81   :  { %v39_v20 = vsub.f32 %v21_v2, %v37_v19 }
  0x83   :  { %v240_v21 = vmul.f32 %v179_v12, %v39_v20  ;;  %v41_v22 = vmul.f32 %v39_v20, %v39_v20 }
  0x85   :  { %v45_v23 = vsel %vm22_vm0, %v41_v22, 0.0 }
  0x86   :  { %46 = vadd.xlane.f32.xlu1 %v45_v23 }
  0xf1   :  { %v44_v34 = vpop.xlane.xlu1 %43 }
  0xf2   :  { %v55_v36 = vmul.f32 %v54_v32, %v44_v34 }
  0xf4   :  { %186 = vrsqrt.f32 %v55_v36  ;;  %vm64_vm3 = vcmp.eq.f32.partialorder %v55_v36, inf  ;;  %v67_v49 = vand.u32 2147483648, %v55_v36  ;;  %vm66_vm4 = vcmp.eq.f32.partialorder %v55_v36, 0.0 }
  0xf9   :  { %v47_v37 = vpop.xlane.xlu1 %46 }
  0xfa   :  { %v187_v38 = vpop.eup %186  ;;  %v56_v39 = vmul.f32 %v54_v32, %v47_v37 }
  0xfb   :  { %v58_v40 = vmul.f32 %v187_v38, %v55_v36 }
  0xfc   :  { %188 = vrsqrt.f32 %v56_v39  ;;  %vm76_vm5 = vcmp.eq.f32.partialorder %v56_v39, inf  ;;  %v79_v57 = vand.u32 2147483648, %v56_v39  ;;  %vm78_vm6 = vcmp.eq.f32.partialorder %v56_v39, 0.0 }
  0xfd   :  { %v59_v41 = vmul.f32 %v187_v38, %v58_v40 }
  0xff   :  { %v60_v42 = vmul.f32 0.5, %v59_v41 }
 0x101   :  { %v61_v43 = vsub.f32 1.5, %v60_v42 }
 0x102   :  { %v189_v44 = vpop.eup %188 }
 0x103   :  { %v62_v45 = vmul.f32 %v187_v38, %v61_v43  ;;  %v70_v46 = vmul.f32 %v189_v44, %v56_v39 }
 0x105   :  { %v63_v47 = vmul.f32 %v62_v45, %v55_v36  ;;  %v71_v48 = vmul.f32 %v189_v44, %v70_v46 }
 0x107   :  { %v72_v50 = vmul.f32 0.5, %v71_v48  ;;  %v65_v51 = vsel %vm64_vm3, %v55_v36, %v63_v47 }
 0x108   :  { %v68_v52 = vsel %vm66_vm4, %v67_v49, %v65_v51 }
 0x109   :  { %v73_v53 = vsub.f32 1.5, %v72_v50  ;;  %v81_v54 = vadd.f32 1e-07, %v68_v52 }
 0x10b   :  { %v74_v55 = vmul.f32 %v189_v44, %v73_v53  ;;  %190 = vrcp.f32 %v81_v54  ;;  %v94_v0 = vand.u32 2147483648, %v81_v54  ;;  %v92_v2 = vand.u32 2147483647, %v81_v54 }
 0x10c   :  { %vm88_vm8 = vweird.f32 %v81_v54 }
 0x10d   :  { %v75_v56 = vmul.f32 %v74_v55, %v56_v39  ;;  %v95_v5 = vor.u32 1.1754944e-38, %v94_v0  ;;  %vm93_vm10 = vcmp.eq.f32.partialorder %v92_v2, 8.507059e+37 }
 0x10f   :  { %v77_v58 = vsel %vm76_vm5, %v56_v39, %v75_v56 }
 0x110   :  { %v80_v59 = vsel %vm78_vm6, %v79_v57, %v77_v58 }
 0x111   :  { %v191_v60 = vpop.eup %190  ;;  %v82_v61 = vadd.f32 1e-07, %v80_v59 }
 0x112   :  { %v84_v62 = vmul.f32 %v191_v60, %v81_v54  ;;  %vm89_vm7 = vweird.f32 %v191_v60 }
 0x113   :  { %192 = vrcp.f32 %v82_v61  ;;  %vm90_vm9 = vmor %vm88_vm8, %vm89_vm7  ;;  %v108_v12 = vand.u32 2147483648, %v82_v61  ;;  %v106_v16 = vand.u32 2147483647, %v82_v61  ;;  %vm102_vm12 = vweird.f32 %v82_v61 }
 0x114   :  { %v85_v63 = vsub.f32 1.0, %v84_v62 }
 0x115   :  { %v109_v18 = vor.u32 1.1754944e-38, %v108_v12  ;;  %vm107_vm14 = vcmp.eq.f32.partialorder %v106_v16, 8.507059e+37 }
 0x116   :  { %v86_v1 = vmul.f32 %v191_v60, %v85_v63 }
 0x118   :  { %v87_v3 = vadd.f32 %v191_v60, %v86_v1 }
 0x119   :  { %v193_v4 = vpop.eup %192 }
 0x11a   :  { %v91_v6 = vsel %vm90_vm9, %v191_v60, %v87_v3  ;;  %v98_v8 = vmul.f32 %v193_v4, %v82_v61  ;;  %vm103_vm11 = vweird.f32 %v193_v4 }
 0x11b   :  { %v96_v9 = vsel %vm93_vm10, %v95_v5, %v91_v6  ;;  %vm104_vm13 = vmor %vm102_vm12, %vm103_vm11 }
 0x11c   :  { %v117_v10 = vmul.f32 %v237_v15, %v96_v9  ;;  %v99_v11 = vsub.f32 1.0, %v98_v8  ;;  %v181_v15 = vld [vmem:[%s274_s4] ss:$0 sm:$0xff] }
 0x11e   :  { %v123_v13 = vadd.f32 %v180_v7, %v117_v10  ;;  %v100_v14 = vmul.f32 %v193_v4, %v99_v11 }
 0x120   :  { %171 = vmatmul.msk.f32.vlgmr.msra.gmra.mxu0 %vm22_vm0, %v123_v13  ;;  %v101_v17 = vadd.f32 %v193_v4, %v100_v14 }
 0x122   :  { %v105_v19 = vsel %vm104_vm13, %v193_v4, %v101_v17 }
 0x123   :  { %v110_v20 = vsel %vm107_vm14, %v109_v18, %v105_v19 }
 0x124   :  { %v118_v22 = vmul.f32 %v240_v21, %v110_v20 }
 0x126   :  { %v124_v23 = vadd.f32 %v180_v7, %v118_v22 }
 0x128   :  { %172 = vmatmul.msk.f32.vlgmr.msra.gmra.mxu1 %vm22_vm0, %v124_v23 }
 0x19d   :  { %v156_v24 = vpop.f32.mrf.mxu0 }
 0x19e   :  { %v157_v25 = vadd.f32 %v181_v15, %v156_v24 }
 0x1a0   :  { %v162_v26 = vmax.f32 %v157_v25, 0.0 }
 0x1a2   :  { %165 = vst.msk [vmem:[%s276_s5] sm:$0xff] %vm164_vm15, %v162_v26 }
 0x1a5   :  { %v159_v27 = vpop.f32.mrf.mxu1 }
 0x1a6   :  { %v160_v28 = vadd.f32 %v181_v15, %v159_v27 }
 0x1a8   :  { %v163_v29 = vmax.f32 %v160_v28, 0.0 }
 0x1aa   :  { %166 = vst.msk [vmem:[%s276_s5 + $0x8] sm:$0xff] %vm164_vm15, %v163_v29 }

// kernel: encoder_layer_forward.9
= control target key start
LH: loop header
LB: loop body
LE: loop exit
PB: predicated region body
PF: predicated region fallthrough
CT: control target
= control target key end

     0   :  { %s197_s0 = inlined_call_operand.vmem [shape: f32[16,64], index: 0, kind: input, shape index: {}]   ;;  %s198_s1 = inlined_call_operand.vmem [shape: f32[64,32], index: 1, kind: input, shape index: {}]   ;;  %s199_s2 = inlined_call_operand.vmem [shape: f32[1,32], index: 2, kind: input, shape index: {}]   ;;  %s200_s3 = inlined_call_operand.vmem [shape: f32[16,32], index: 3, kind: input, shape index: {}]   ;;  %s201_s4 = inlined_call_operand.hbm [shape: f32[16,32], index: 4, kind: output, shape index: {}]  }
   0x1   :  { %v27_v0 = vld [vmem:[%s198_s1 + $0x38] sm:$0xff]  ;;  %v26_v1 = vld [vmem:[%s198_s1 + $0x30] sm:$0xff]  ;;  %v25_v2 = vld [vmem:[%s198_s1 + $0x28] sm:$0xff] }
   0x2   :  { %47 = vmatpush.msra.mxu0 %v27_v0  ;;  %89 = vmatpush.msra.mxu1 %v27_v0  ;;  %v24_v3 = vld [vmem:[%s198_s1 + $0x20] sm:$0xff] }
   0x4   :  { %48 = vmatpush.msra.mxu0 %v26_v1  ;;  %90 = vmatpush.msra.mxu1 %v26_v1 }
   0x5   :  { %9 = vsyncpa [#allocation3], 0  ;;  %v23_v4 = vld [vmem:[%s198_s1 + $0x18] sm:$0xff]  ;;  %v22_v5 = vld [vmem:[%s198_s1 + $0x10] sm:$0xff]  ;;  %vm32_vm0 = vcmask 523264   ;;  %s127_s14 = smov [#allocation2]  }
   0x6   :  { %49 = vmatpush.msra.mxu0 %v25_v2  ;;  %91 = vmatpush.msra.mxu1 %v25_v2  ;;  %v21_v6 = vld [vmem:[%s198_s1 + $0x8] sm:$0xff]  ;;  %v20_v7 = vld [vmem:[%s198_s1] sm:$0xff]  ;;  %s75_s17 = sshll.u32 %s201_s4, 4  ;;  %vm66_vm1 = vcmask 261120   ;;  %s129_s18 = smov 8   ;;  %s76_s17 = int_to_ptr.hbm [resolvable:$true] %s75_s17 }
   0x7   :  { %v18_v8 = vld [vmem:[%s197_s0] sm:$0xff]  ;;  %v19_v9 = vld [vmem:[%s197_s0 + $0x8] sm:$0xff]  ;;  %s73_s0 = sshll.u32 %s127_s14, 4  ;;  %s74_s0 = int_to_ptr.vmem [resolvable:$true] %s73_s0 }
   0x8   :  { %50 = vmatpush.msra.mxu0 %v24_v3  ;;  %92 = vmatpush.msra.mxu1 %v24_v3  ;;  %v100_v10 = vld [vmem:[%s199_s2] ss:$0 sm:$0xff]  ;;  %v63_v14 = vld [vmem:[%s200_s3 + $0x8] sm:$0xff]  ;;  %s128_s2 = smov 128  }
   0x9   :  { %v62_v12 = vld [vmem:[%s200_s3] sm:$0xff] }
   0xa   :  { %51 = vmatpush.msra.mxu0 %v23_v4  ;;  %93 = vmatpush.msra.mxu1 %v23_v4 }
   0xc   :  { %52 = vmatpush.msra.mxu0 %v22_v5  ;;  %94 = vmatpush.msra.mxu1 %v22_v5 }
   0xe   :  { %53 = vmatpush.msra.mxu0 %v21_v6  ;;  %95 = vmatpush.msra.mxu1 %v21_v6 }
  0x10   :  { %54 = vmatpush.msra.mxu0 %v20_v7  ;;  %96 = vmatpush.msra.mxu1 %v20_v7 }
  0x11   :  { %87 = vmatmul.msk.f32.vlgmr.msra.gmra.mxu0 %vm32_vm0, %v18_v8  ;;  %88 = vmatmul.msk.f32.vlgmr.msra.gmra.mxu1 %vm32_vm0, %v19_v9 }
  0x8e   :  { %v56_v11 = vpop.f32.mrf.mxu0  ;;  %v59_v13 = vpop.f32.mrf.mxu1 }
  0x8f   :  { %v57_v15 = vadd.f32 %v100_v10, %v56_v11  ;;  %v60_v16 = vadd.f32 %v100_v10, %v59_v13 }
  0x91   :  { %v64_v17 = vadd.f32 %v62_v12, %v57_v15  ;;  %v65_v18 = vadd.f32 %v63_v14, %v60_v16 }
  0x93   :  { %67 = vst.msk [vmem:[#allocation2] sm:$0xff] %vm66_vm1, %v64_v17 }
  0x94   :  { %68 = vst.msk [vmem:[#allocation2 + $0x8] sm:$0xff] %vm66_vm1, %v65_v18 }
  0x95   :  { %81 = dma.vmem_to_hbm [thread:$0]  %s74_s0, 256, %s76_s17, [#allocation3], %s128_s2, %s128_s2, %s129_s18  }
  0x96   :  { %125 = dma.done.wait [#allocation3], 256  }
  0x97   :  { %126 = vsyncadd [#allocation3], 4294967040 }
  0x98   :  { %86 = vsyncpa [#allocation3], 1 }

</bundles_post_ra>
